<compile_context>
chip_gen: v7x
topology: tpu7x:2x2x1
jax: 0.10.0
libtpu: 0.0.40
codegen_flags: <defaults>
</compile_context>

<pallas_src>
import functools

import jax
import jax.numpy as jnp
from jax.experimental import pallas as pl
from jax.experimental.pallas import tpu as pltpu

NEG_SLOPE = 0.01   # torch F.leaky_relu default negative_slope
BN_EPS = 1e-5      # torch BatchNorm1d default eps


def actor_kernel(x_ref, scale_ref, shift_ref,
                 w1_ref, b1_ref, w2_ref, b2_ref, w3_ref, b3_ref,
                 out_ref):
    # --- BatchNorm1d with hoisted stats: xn = x * scale + shift (f32, VPU) ---
    xn = x_ref[...] * scale_ref[...] + shift_ref[...]

    # --- fc1 + leaky_relu : bf16 operands, f32 accumulation on the MXU ---
    h1 = jnp.dot(xn.astype(jnp.bfloat16), w1_ref[...],
                 preferred_element_type=jnp.float32) + b1_ref[...]
    h1 = jnp.maximum(h1, NEG_SLOPE * h1)

    # --- fc2 + leaky_relu ---
    h2 = jnp.dot(h1.astype(jnp.bfloat16), w2_ref[...],
                 preferred_element_type=jnp.float32) + b2_ref[...]
    h2 = jnp.maximum(h2, NEG_SLOPE * h2)

    # --- fc3 + tanh ---
    h3 = jnp.dot(h2.astype(jnp.bfloat16), w3_ref[...],
                 preferred_element_type=jnp.float32) + b3_ref[...]
    out_ref[...] = jnp.tanh(h3).astype(out_ref.dtype)


def _round_up(x, m):
    return ((x + m - 1) // m) * m


@functools.partial(jax.jit, static_argnames=("tm",))
def actor_forward(state, params, tm=256):
    """state: (B, s_dim) float32.  params: dict from init_params (f32)."""
    B, s_dim = state.shape
    a_dim = params["w3"].shape[1]

    # BatchNorm1d training-mode statistics, hoisted out of the kernel.
    # TODO(synk): for torch .eval() semantics, substitute running mean/var here.
    mean = jnp.mean(state, axis=0, keepdims=True)                     # (1, s_dim)
    var = jnp.mean(jnp.square(state - mean), axis=0, keepdims=True)   # biased var
    inv_std = jax.lax.rsqrt(var + BN_EPS)
    scale = inv_std * params["gamma"]                                 # (1, s_dim)
    shift = params["beta"] - mean * scale                             # (1, s_dim)

    # Batch tiling: tm rows per grid step (sublane-aligned), pad B if needed.
    tm_eff = min(tm, _round_up(B, 8))
    b_pad = _round_up(B, tm_eff)
    x = state if b_pad == B else jnp.pad(state, ((0, b_pad - B), (0, 0)))
    grid = (b_pad // tm_eff,)

    # bf16 weights: halves weight DMA, native MXU input dtype everywhere.
    w1 = params["w1"].astype(jnp.bfloat16)
    w2 = params["w2"].astype(jnp.bfloat16)
    w3 = params["w3"].astype(jnp.bfloat16)
    b1, b2, b3 = params["b1"], params["b2"], params["b3"]

    consts = (scale, shift, w1, b1, w2, b2, w3, b3)

    def const_spec(a):
        return pl.BlockSpec(a.shape, lambda i: (0,) * a.ndim)

    out = pl.pallas_call(
        actor_kernel,
        out_shape=jax.ShapeDtypeStruct((b_pad, a_dim), jnp.float32),
        grid=grid,
        in_specs=[pl.BlockSpec((tm_eff, s_dim), lambda i: (i, 0))]
                 + [const_spec(a) for a in consts],
        out_specs=pl.BlockSpec((tm_eff, a_dim), lambda i: (i, 0)),
        compiler_params=pltpu.CompilerParams(
            dimension_semantics=("parallel",)),
    )(x, *consts)
    return out[:B]


def init_params(key, s_dim, a_dim, hidden=128):
    """Parameter init mirroring Actor.__init__/reset_parameters (f32 master copy).
    Weights stored transposed as (in, out) = torch weight.T."""
    ks = jax.random.split(key, 6)
    lim1 = 1.0 / jnp.sqrt(jnp.float32(hidden))   # hidden_init uses weight.size(0)=out
    lim2 = 1.0 / jnp.sqrt(jnp.float32(hidden))
    lim3 = 0.003
    w1 = jax.random.uniform(ks[0], (s_dim, hidden), jnp.float32, -lim1, lim1)
    w2 = jax.random.uniform(ks[1], (hidden, hidden), jnp.float32, -lim2, lim2)
    w3 = jax.random.uniform(ks[2], (hidden, a_dim), jnp.float32, -lim3, lim3)
    # biases keep torch's default Linear bias init (uniform +/- 1/sqrt(fan_in))
    b1 = jax.random.uniform(ks[3], (1, hidden), jnp.float32,
                            -1.0 / jnp.sqrt(jnp.float32(s_dim)),
                            1.0 / jnp.sqrt(jnp.float32(s_dim)))
    b2 = jax.random.uniform(ks[4], (1, hidden), jnp.float32,
                            -1.0 / jnp.sqrt(jnp.float32(hidden)),
                            1.0 / jnp.sqrt(jnp.float32(hidden)))
    b3 = jax.random.uniform(ks[5], (1, a_dim), jnp.float32,
                            -1.0 / jnp.sqrt(jnp.float32(hidden)),
                            1.0 / jnp.sqrt(jnp.float32(hidden)))
    gamma = jnp.ones((1, s_dim), jnp.float32)    # BatchNorm1d affine weight
    beta = jnp.zeros((1, s_dim), jnp.float32)    # BatchNorm1d affine bias
    return dict(w1=w1, b1=b1, w2=w2, b2=b2, w3=w3, b3=b3, gamma=gamma, beta=beta)


def actor_ref(state, p):
    """Pure-JAX f32 reference (training-mode BatchNorm), for correctness check."""
    mean = jnp.mean(state, axis=0, keepdims=True)
    var = jnp.mean((state - mean) ** 2, axis=0, keepdims=True)
    xn = (state - mean) / jnp.sqrt(var + BN_EPS) * p["gamma"] + p["beta"]
    h1 = xn @ p["w1"] + p["b1"]
    h1 = jnp.where(h1 > 0, h1, NEG_SLOPE * h1)
    h2 = h1 @ p["w2"] + p["b2"]
    h2 = jnp.where(h2 > 0, h2, NEG_SLOPE * h2)
    return jnp.tanh(h2 @ p["w3"] + p["b3"])


if __name__ == "__main__":
    S_DIM, A_DIM = 32, 4

    key = jax.random.PRNGKey(0)
    k_params, k_state = jax.random.split(key)
    params = init_params(k_params, S_DIM, A_DIM)

    # Cover: single-tile small batch, padded odd batch, multi-tile batch.
    for B in (8, 200, 512):
        state = jax.random.normal(jax.random.fold_in(k_state, B),
                                  (B, S_DIM), jnp.float32)
        out = jax.block_until_ready(actor_forward(state, params))
        ref = actor_ref(state, params)
        assert out.shape == (B, A_DIM)
        # bf16 matmul operands vs f32 reference -> modest tolerance.
        assert jnp.allclose(out, ref, atol=3e-2, rtol=3e-2), f"mismatch at B={B}"

    print("KERNEL_OK")
</pallas_src>

<mosaic_0001>
module attributes {stable_mosaic.version = 11 : i64} {
  func.func @actor_kernel(%arg0: i32, %arg1: memref<8x32xf32, #tpu.memory_space<vmem>>, %arg2: memref<1x32xf32, #tpu.memory_space<vmem>>, %arg3: memref<1x32xf32, #tpu.memory_space<vmem>>, %arg4: memref<32x128xbf16, #tpu.memory_space<vmem>>, %arg5: memref<1x128xf32, #tpu.memory_space<vmem>>, %arg6: memref<128x128xbf16, #tpu.memory_space<vmem>>, %arg7: memref<1x128xf32, #tpu.memory_space<vmem>>, %arg8: memref<128x4xbf16, #tpu.memory_space<vmem>>, %arg9: memref<1x4xf32, #tpu.memory_space<vmem>>, %arg10: memref<8x4xf32, #tpu.memory_space<vmem>>) attributes {dimension_semantics = [#tpu.dimension_semantics<parallel>], iteration_bounds = array<i64: 1>, scalar_prefetch = 0 : i64, scratch_operands = 0 : i64, tpu.core_type = #tpu.core_type<tc>, window_params = [{transform_indices = @transform_0, window_bounds = array<i64: 8, 32>}, {pipeline_mode = #tpu.pipeline_mode<synchronous>, transform_indices = @transform_1, window_bounds = array<i64: 1, 32>}, {pipeline_mode = #tpu.pipeline_mode<synchronous>, transform_indices = @transform_2, window_bounds = array<i64: 1, 32>}, {pipeline_mode = #tpu.pipeline_mode<synchronous>, transform_indices = @transform_3, window_bounds = array<i64: 32, 128>}, {pipeline_mode = #tpu.pipeline_mode<synchronous>, transform_indices = @transform_4, window_bounds = array<i64: 1, 128>}, {pipeline_mode = #tpu.pipeline_mode<synchronous>, transform_indices = @transform_5, window_bounds = array<i64: 128, 128>}, {pipeline_mode = #tpu.pipeline_mode<synchronous>, transform_indices = @transform_6, window_bounds = array<i64: 1, 128>}, {pipeline_mode = #tpu.pipeline_mode<synchronous>, transform_indices = @transform_7, window_bounds = array<i64: 128, 4>}, {pipeline_mode = #tpu.pipeline_mode<synchronous>, transform_indices = @transform_8, window_bounds = array<i64: 1, 4>}, {transform_indices = @transform_9, window_bounds = array<i64: 8, 4>}]} {
    %c0 = arith.constant 0 : index
    %c0_0 = arith.constant 0 : index
    %0 = vector.load %arg1[%c0, %c0_0] : memref<8x32xf32, #tpu.memory_space<vmem>>, vector<8x32xf32>
    %c0_1 = arith.constant 0 : index
    %c0_2 = arith.constant 0 : index
    %1 = vector.load %arg2[%c0_1, %c0_2] : memref<1x32xf32, #tpu.memory_space<vmem>>, vector<1x32xf32>
    %2 = vector.broadcast %1 : vector<1x32xf32> to vector<8x32xf32>
    %3 = arith.mulf %0, %2 : vector<8x32xf32>
    %c0_3 = arith.constant 0 : index
    %c0_4 = arith.constant 0 : index
    %4 = vector.load %arg3[%c0_3, %c0_4] : memref<1x32xf32, #tpu.memory_space<vmem>>, vector<1x32xf32>
    %5 = vector.broadcast %4 : vector<1x32xf32> to vector<8x32xf32>
    %6 = arith.addf %3, %5 : vector<8x32xf32>
    %7 = arith.truncf %6 : vector<8x32xf32> to vector<8x32xbf16>
    %c0_5 = arith.constant 0 : index
    %c0_6 = arith.constant 0 : index
    %8 = vector.load %arg4[%c0_5, %c0_6] : memref<32x128xbf16, #tpu.memory_space<vmem>>, vector<32x128xbf16>
    %cst = arith.constant dense<0.000000e+00> : vector<8x128xf32>
    %9 = tpu.matmul %7, %8, %cst {dimension_numbers = #tpu.dot_dimension_numbers<[1], [0], [0], [1], [0, 0, 1, 1], [], []>} : vector<8x32xbf16>, vector<32x128xbf16>, vector<8x128xf32> -> vector<8x128xf32>
    %c0_7 = arith.constant 0 : index
    %c0_8 = arith.constant 0 : index
    %10 = vector.load %arg5[%c0_7, %c0_8] : memref<1x128xf32, #tpu.memory_space<vmem>>, vector<1x128xf32>
    %11 = vector.broadcast %10 : vector<1x128xf32> to vector<8x128xf32>
    %12 = arith.addf %9, %11 : vector<8x128xf32>
    %cst_9 = arith.constant 0.00999999977 : f32
    %13 = vector.broadcast %cst_9 : f32 to vector<8x128xf32>
    %14 = arith.mulf %13, %12 : vector<8x128xf32>
    %15 = arith.maximumf %12, %14 : vector<8x128xf32>
    %16 = arith.truncf %15 : vector<8x128xf32> to vector<8x128xbf16>
    %c0_10 = arith.constant 0 : index
    %c0_11 = arith.constant 0 : index
    %17 = vector.load %arg6[%c0_10, %c0_11] : memref<128x128xbf16, #tpu.memory_space<vmem>>, vector<128x128xbf16>
    %cst_12 = arith.constant dense<0.000000e+00> : vector<8x128xf32>
    %18 = tpu.matmul %16, %17, %cst_12 {dimension_numbers = #tpu.dot_dimension_numbers<[1], [0], [0], [1], [0, 0, 1, 1], [], []>} : vector<8x128xbf16>, vector<128x128xbf16>, vector<8x128xf32> -> vector<8x128xf32>
    %c0_13 = arith.constant 0 : index
    %c0_14 = arith.constant 0 : index
    %19 = vector.load %arg7[%c0_13, %c0_14] : memref<1x128xf32, #tpu.memory_space<vmem>>, vector<1x128xf32>
    %20 = vector.broadcast %19 : vector<1x128xf32> to vector<8x128xf32>
    %21 = arith.addf %18, %20 : vector<8x128xf32>
    %cst_15 = arith.constant 0.00999999977 : f32
    %22 = vector.broadcast %cst_15 : f32 to vector<8x128xf32>
    %23 = arith.mulf %22, %21 : vector<8x128xf32>
    %24 = arith.maximumf %21, %23 : vector<8x128xf32>
    %25 = arith.truncf %24 : vector<8x128xf32> to vector<8x128xbf16>
    %c0_16 = arith.constant 0 : index
    %c0_17 = arith.constant 0 : index
    %26 = vector.load %arg8[%c0_16, %c0_17] : memref<128x4xbf16, #tpu.memory_space<vmem>>, vector<128x4xbf16>
    %cst_18 = arith.constant dense<0.000000e+00> : vector<8x4xf32>
    %27 = tpu.matmul %25, %26, %cst_18 {dimension_numbers = #tpu.dot_dimension_numbers<[1], [0], [0], [1], [0, 0, 1, 1], [], []>} : vector<8x128xbf16>, vector<128x4xbf16>, vector<8x4xf32> -> vector<8x4xf32>
    %c0_19 = arith.constant 0 : index
    %c0_20 = arith.constant 0 : index
    %28 = vector.load %arg9[%c0_19, %c0_20] : memref<1x4xf32, #tpu.memory_space<vmem>>, vector<1x4xf32>
    %29 = vector.broadcast %28 : vector<1x4xf32> to vector<8x4xf32>
    %30 = arith.addf %27, %29 : vector<8x4xf32>
    %31 = math.tanh %30 : vector<8x4xf32>
    %c0_21 = arith.constant 0 : index
    %c0_22 = arith.constant 0 : index
    %32 = vector.load %arg10[%c0_21, %c0_22] : memref<8x4xf32, #tpu.memory_space<vmem>>, vector<8x4xf32>
    tpu.vector_store %arg10[%c0_21, %c0_22], %31 {strides = array<i32>} : memref<8x4xf32, #tpu.memory_space<vmem>>, vector<8x4xf32>,
    return
  }
  func.func @transform_0(%arg0: i32) -> (i32, i32) {
    %c0_i32 = arith.constant 0 : i32
    %c0_i32_0 = arith.constant 0 : i32
    return %arg0, %c0_i32 : i32, i32
  }
  func.func @transform_1(%arg0: i32) -> (i32, i32) {
    %c0_i32 = arith.constant 0 : i32
    %c0_i32_0 = arith.constant 0 : i32
    %c0_i32_1 = arith.constant 0 : i32
    return %c0_i32, %c0_i32_0 : i32, i32
  }
  func.func @transform_2(%arg0: i32) -> (i32, i32) {
    %c0_i32 = arith.constant 0 : i32
    %c0_i32_0 = arith.constant 0 : i32
    %c0_i32_1 = arith.constant 0 : i32
    return %c0_i32, %c0_i32_0 : i32, i32
  }
  func.func @transform_3(%arg0: i32) -> (i32, i32) {
    %c0_i32 = arith.constant 0 : i32
    %c0_i32_0 = arith.constant 0 : i32
    %c0_i32_1 = arith.constant 0 : i32
    return %c0_i32, %c0_i32_0 : i32, i32
  }
  func.func @transform_4(%arg0: i32) -> (i32, i32) {
    %c0_i32 = arith.constant 0 : i32
    %c0_i32_0 = arith.constant 0 : i32
    %c0_i32_1 = arith.constant 0 : i32
    return %c0_i32, %c0_i32_0 : i32, i32
  }
  func.func @transform_5(%arg0: i32) -> (i32, i32) {
    %c0_i32 = arith.constant 0 : i32
    %c0_i32_0 = arith.constant 0 : i32
    %c0_i32_1 = arith.constant 0 : i32
    return %c0_i32, %c0_i32_0 : i32, i32
  }
  func.func @transform_6(%arg0: i32) -> (i32, i32) {
    %c0_i32 = arith.constant 0 : i32
    %c0_i32_0 = arith.constant 0 : i32
    %c0_i32_1 = arith.constant 0 : i32
    return %c0_i32, %c0_i32_0 : i32, i32
  }
  func.func @transform_7(%arg0: i32) -> (i32, i32) {
    %c0_i32 = arith.constant 0 : i32
    %c0_i32_0 = arith.constant 0 : i32
    %c0_i32_1 = arith.constant 0 : i32
    return %c0_i32, %c0_i32_0 : i32, i32
  }
  func.func @transform_8(%arg0: i32) -> (i32, i32) {
    %c0_i32 = arith.constant 0 : i32
    %c0_i32_0 = arith.constant 0 : i32
    %c0_i32_1 = arith.constant 0 : i32
    return %c0_i32, %c0_i32_0 : i32, i32
  }
  func.func @transform_9(%arg0: i32) -> (i32, i32) {
    %c0_i32 = arith.constant 0 : i32
    %c0_i32_0 = arith.constant 0 : i32
    return %arg0, %c0_i32 : i32, i32
  }
}

</mosaic_0001>

<bundles_post_ra>
// kernel: actor_forward.1
= control target key start
LH: loop header
LB: loop body
LE: loop exit
PB: predicated region body
PF: predicated region fallthrough
CT: control target
= control target key end

     0   :  { %v468_v0 = vmov 0.0   ;;  %vm469_vm0 = vmmov 0   ;;  %vm74_vm1 = vcmask 261120   ;;  %vm347_vm2 = vcmask 31744   ;;  %s619_s3 = inlined_call_operand.vmem [shape: bf16[32,128], index: 3, kind: input, shape index: {}]   ;;  %s620_s0 = inlined_call_operand.vmem [shape: f32[8,32], index: 0, kind: input, shape index: {}]   ;;  %s621_s1 = inlined_call_operand.vmem [shape: f32[1,32], index: 1, kind: input, shape index: {}]   ;;  %s622_s2 = inlined_call_operand.vmem [shape: f32[1,32], index: 2, kind: input, shape index: {}]   ;;  %s623_s5 = inlined_call_operand.vmem [shape: bf16[128,128], index: 5, kind: input, shape index: {}]   ;;  %s624_s7 = inlined_call_operand.vmem [shape: bf16[128,4], index: 7, kind: input, shape index: {}]   ;;  %s625_s4 = inlined_call_operand.vmem [shape: f32[1,128], index: 4, kind: input, shape index: {}]   ;;  %s626_s6 = inlined_call_operand.vmem [shape: f32[1,128], index: 6, kind: input, shape index: {}]   ;;  %s627_s8 = inlined_call_operand.vmem [shape: f32[1,4], index: 8, kind: input, shape index: {}]   ;;  %s628_s9 = inlined_call_operand.vmem [shape: f32[8,4], index: 9, kind: output, shape index: {}]  }
   0x1   :  { %398 = vmatprep.subr.bf16.mxu0 %v468_v0  ;;  %v448_v1 = vld [vmem:[%s619_s3] sm:$0xff]   ;;  %402 = vmatprep.mubr.msk.bf16.mxu0 %vm469_vm0, %v468_v0  ;;  %v449_v2 = vld [vmem:[%s619_s3 + $0x8] sm:$0xff]   ;;  %v452_v11 = vld [vmem:[%s623_s5 + $0x10] sm:$0xff]  }
   0x2   :  { %406 = vmatprep.subr.bf16.mxu1 %v468_v0  ;;  %422 = vmatprep.mubr.msk.bf16.mxu1 %vm469_vm0, %v468_v0  ;;  %v33_v3 = vld [vmem:[%s620_s0] sm:$0xff]  ;;  %v451_v9 = vld [vmem:[%s623_s5 + $0x8] sm:$0xff]   ;;  %v453_v12 = vld [vmem:[%s623_s5 + $0x18] sm:$0xff]  }
   0x3   :  { %399 = vmatpush3.bf16.msra.mxu0 %v448_v1  ;;  %v353_v4 = vld [vmem:[%s621_s1] ss:$0 sm:$0xff]  ;;  %v455_v14 = vld [vmem:[%s623_s5 + $0x28] sm:$0xff]   ;;  %v456_v15 = vld [vmem:[%s623_s5 + $0x30] sm:$0xff]  }
   0x4   :  { %v354_v5 = vld [vmem:[%s622_s2] ss:$0 sm:$0xff]  ;;  %400 = vmatprep.subr.bf16.mxu0 %v468_v0  ;;  %v41_v6 = vmul.f32 %v353_v4, %v33_v3  ;;  %v457_v16 = vld [vmem:[%s623_s5 + $0x38] sm:$0xff]   ;;  %v459_v18 = vld [vmem:[%s624_s7 + $0x8] sm:$0xff]  }
   0x5   :  { %v450_v7 = vld [vmem:[%s623_s5] sm:$0xff]   ;;  %v460_v19 = vld [vmem:[%s624_s7 + $0x10] sm:$0xff]   ;;  %v461_v20 = vld [vmem:[%s624_s7 + $0x18] sm:$0xff]  }
   0x6   :  { %v49_v8 = vadd.f32 %v354_v5, %v41_v6  ;;  %407 = vmatpush3.bf16.msra.mxu1 %v450_v7  ;;  %v454_v13 = vld [vmem:[%s623_s5 + $0x20] sm:$0xff]   ;;  %v463_v22 = vld [vmem:[%s624_s7 + $0x28] sm:$0xff]   ;;  %v464_v32 = vld [vmem:[%s624_s7 + $0x30] sm:$0xff]  }
   0x7   :  { %401 = vmatpush3.bf16.msra.mxu0 %v449_v2  ;;  %408 = vmatprep.subr.bf16.mxu1 %v468_v0  ;;  %v458_v17 = vld [vmem:[%s624_s7] sm:$0xff]   ;;  %v465_v33 = vld [vmem:[%s624_s7 + $0x38] sm:$0xff]  }
   0x8   :  { %v50_v10 = vpack.c.bf16 %v49_v8, %v49_v8  ;;  %426 = vmatprep.subr.bf16.mxu0 %v468_v0  ;;  %v462_v21 = vld [vmem:[%s624_s7 + $0x20] sm:$0xff]  }
   0x9   :  { %v355_v23 = vld [vmem:[%s625_s4] ss:$0 sm:$0xff] }
   0xa   :  { %403 = vmatmul.mubr.msk.bf16.vlgmr.msra.gmra.mrb[0].mxu0 %vm74_vm1, %v50_v10  ;;  %409 = vmatpush3.bf16.msra.mxu1 %v451_v9  ;;  %v359_v34 = vld [vmem:[%s626_s6] ss:$0 sm:$0xff] }
   0xb   :  { %410 = vmatprep.subr.bf16.mxu1 %v468_v0  ;;  %442 = vmatprep.mubr.msk.bf16.mxu0 %vm469_vm0, %v468_v0  ;;  %v368_v43 = vld [vmem:[%s627_s8] ss:$0 sm:$0xff] }
   0xc   :  { %427 = vmatpush3.bf16.msra.mxu0 %v458_v17 }
   0xd   :  { %428 = vmatprep.subr.bf16.mxu0 %v468_v0 }
   0xe   :  { %411 = vmatpush3.bf16.msra.mxu1 %v452_v11 }
   0xf   :  { %412 = vmatprep.subr.bf16.mxu1 %v468_v0 }
  0x10   :  { %429 = vmatpush3.bf16.msra.mxu0 %v459_v18 }
  0x11   :  { %430 = vmatprep.subr.bf16.mxu0 %v468_v0 }
  0x12   :  { %413 = vmatpush3.bf16.msra.mxu1 %v453_v12 }
  0x13   :  { %414 = vmatprep.subr.bf16.mxu1 %v468_v0 }
  0x14   :  { %431 = vmatpush3.bf16.msra.mxu0 %v460_v19 }
  0x15   :  { %432 = vmatprep.subr.bf16.mxu0 %v468_v0 }
  0x16   :  { %415 = vmatpush3.bf16.msra.mxu1 %v454_v13 }
  0x17   :  { %416 = vmatprep.subr.bf16.mxu1 %v468_v0 }
  0x18   :  { %433 = vmatpush3.bf16.msra.mxu0 %v461_v20 }
  0x19   :  { %434 = vmatprep.subr.bf16.mxu0 %v468_v0 }
  0x1a   :  { %417 = vmatpush3.bf16.msra.mxu1 %v455_v14 }
  0x1b   :  { %418 = vmatprep.subr.bf16.mxu1 %v468_v0 }
  0x1c   :  { %435 = vmatpush3.bf16.msra.mxu0 %v462_v21 }
  0x1d   :  { %436 = vmatprep.subr.bf16.mxu0 %v468_v0 }
  0x1e   :  { %419 = vmatpush3.bf16.msra.mxu1 %v456_v15 }
  0x1f   :  { %420 = vmatprep.subr.bf16.mxu1 %v468_v0 }
  0x20   :  { %437 = vmatpush3.bf16.msra.mxu0 %v463_v22 }
  0x21   :  { %438 = vmatprep.subr.bf16.mxu0 %v468_v0 }
  0x22   :  { %421 = vmatpush3.bf16.msra.mxu1 %v457_v16 }
  0x24   :  { %439 = vmatpush3.bf16.msra.mxu0 %v464_v32 }
  0x25   :  { %440 = vmatprep.subr.bf16.mxu0 %v468_v0 }
  0x28   :  { %441 = vmatpush3.bf16.msra.mxu0 %v465_v33 }
  0xdd   :  { %v112_v24 = vpop.f32.mrb[0].mxu0 }
  0xde   :  { %v113_v25 = vadd.f32 %v355_v23, %v112_v24  ;;  %v404_v26 = vpop.f32.mrb[1].mxu0 }
  0xdf   :  { %v115_v27 = vpop.f32.mrb[2].mxu0 }
  0xe0   :  { %v118_v28 = vmul.f32 0.01, %v113_v25  ;;  %v405_v29 = vpop.f32.mrb[3].mxu0 }
  0xe2   :  { %v119_v30 = vmax.f32 %v113_v25, %v118_v28 }
  0xe4   :  { %v120_v31 = vpack.c.bf16 %v119_v30, %v119_v30 }
  0xe6   :  { %423 = vmatmul.mubr.bf16.vlgmr.msra.gmra.mrb[0].mxu1 %v120_v31 }
 0x1b9   :  { %v226_v35 = vpop.f32.mrb[0].mxu1 }
 0x1ba   :  { %v227_v36 = vadd.f32 %v359_v34, %v226_v35  ;;  %v424_v37 = vpop.f32.mrb[1].mxu1 }
 0x1bb   :  { %v229_v38 = vpop.f32.mrb[2].mxu1 }
 0x1bc   :  { %v232_v39 = vmul.f32 0.01, %v227_v36  ;;  %v425_v40 = vpop.f32.mrb[3].mxu1 }
 0x1be   :  { %v233_v41 = vmax.f32 %v227_v36, %v232_v39 }
 0x1c0   :  { %v234_v42 = vpack.c.bf16 %v233_v41, %v233_v41 }
 0x1c2   :  { %443 = vmatmul.mubr.bf16.vlgmr.msra.gmra.mrb[4].mxu0 %v234_v42 }
 0x295   :  { %v340_v44 = vpop.f32.mrb[4].mxu0 }
 0x296   :  { %v341_v45 = vadd.f32 %v368_v43, %v340_v44  ;;  %v444_v46 = vpop.f32.mrb[5].mxu0 }
 0x297   :  { %v343_v47 = vpop.f32.mrb[6].mxu0 }
 0x298   :  { %466 = vtanh.f32 %v341_v45  ;;  %v445_v48 = vpop.f32.mrb[7].mxu0 }
 0x2a2   :  { %v467_v49 = vpop.eup %466 }
 0x2a3   :  { %348 = vst.msk [vmem:[%s628_s9] sm:$0xff] %vm347_vm2, %v467_v49 }

</bundles_post_ra>
